<compile_context>
chip_gen: v7x
topology: tpu7x:2x2x1
jax: 0.10.0
libtpu: 0.0.40
codegen_flags: <defaults>
</compile_context>

<pallas_src>
import math

import jax
import jax.numpy as jnp
from jax.experimental import pallas as pl
from jax.experimental.pallas import tpu as pltpu

_LANE = 128
_SUBLANE = 8
_BLOCK_BYTES = 1 << 20           # ~1 MiB per pipelined transpose block
_CASE1_BLOCK_BYTES = 4 << 20     # folded copy slabs; 4x (in+out, double-buffered) < 32 MiB
_VMEM_LIMIT = 32 * 1024 * 1024   # explicit scoped-VMEM request, safe on v5e/v6e/v7x
# TODO(synk): for bf16/int8 inputs the sublane packing is 16/32 rows per vreg;
# the 8-row alignment used below is correct but not always optimal there.


def _prod(xs):
    return math.prod(xs) if xs else 1


def _compiler_params(n_grid):
    # Every output block is written exactly once -> all axes are independent,
    # so mark them "parallel" (lets v7x shard the grid across its 2 TensorCores).
    return pltpu.CompilerParams(
        dimension_semantics=("parallel",) * n_grid,
        vmem_limit_bytes=_VMEM_LIMIT,
    )


def _cost(x):
    # Pure data movement: 0 flops, read + write every byte once.
    nbytes = int(x.size) * x.dtype.itemsize
    return pl.CostEstimate(flops=0, transcendentals=0, bytes_accessed=2 * nbytes)


# ----------------------------------------------------------------------------- kernels
def _copy_kernel(x_ref, o_ref):
    # Pure data movement: the axis permutation lives entirely in the BlockSpecs.
    o_ref[...] = x_ref[...]


def _t2d_kernel(x_ref, o_ref):
    # (TM, TN) -> (TN, TM) minor-dims transpose (XLU).
    o_ref[...] = x_ref[...].T


def _dense_kernel(x_ref, o_ref):
    # x_ref: (M, TK*W)  ->  o_ref: (TK, W*M).
    # 2-D minor transpose followed by a pure shape cast (identical linear order)
    # so every output row is a lane-dense W*M-wide store instead of a masked
    # width-M partial store.
    # TODO(synk): pltpu.einshape("m(kw)->k(wm)") would express this in one
    # lane-layout-aware op if the grouping syntax is available.
    tk, wm = o_ref.shape
    o_ref[...] = x_ref[...].T.reshape(tk, wm)


# ----------------------------------------------------------------------------- helpers
def _movedim_perm(ndim, a, b):
    """Permutation p such that out = transpose(x, p) == x.movedim(a, b)."""
    rest = [d for d in range(ndim) if d != a]
    perm = rest[:b] + [a] + rest[b:]
    return tuple(perm)


def _tile128(dim, limit):
    """Largest divisor of `dim` that is a multiple of 128 and <= limit (or dim)."""
    if dim <= limit:
        return dim
    t = (min(limit, dim) // _LANE) * _LANE
    while t >= _LANE:
        if dim % t == 0:
            return t
        t -= _LANE
    return dim  # no aligned divisor: take the whole extent (vmem_limit raised above)


def _pick_h_tile(h, row_bytes, budget):
    """Largest multiple-of-8 divisor of h whose slab fits the budget (else h)."""
    best = None
    for t in range(_SUBLANE, h, _SUBLANE):
        if h % t == 0 and t * row_bytes <= budget:
            best = t
    return best if best is not None else h


# ----------------------------------------------------------------------------- paths
def _leading_permute(x, perm):
    """Permutation that leaves the last two dims in place: copy kernel."""
    nd = x.ndim
    lead = nd - 2
    out_shape = tuple(x.shape[p] for p in perm)
    itemsize = x.dtype.itemsize

    # Fold the trailing run of leading dims that stay in place into the block
    # (fewer grid steps, much larger DMAs), subject to a VMEM budget.
    s = lead
    while s > 0 and perm[s - 1] == s - 1:
        s -= 1

    def tail_bytes(s_):
        return _prod(x.shape[s_:]) * itemsize

    while s < lead and tail_bytes(s) > _CASE1_BLOCK_BYTES:
        s += 1

    H, W = x.shape[-2], x.shape[-1]
    TH = H
    if tail_bytes(lead) > _CASE1_BLOCK_BYTES:
        # Even a single (H, W) slab is too big (matters on v7x's 64 MiB VMEM):
        # split H into aligned tiles.
        TH = _pick_h_tile(H, W * itemsize, _CASE1_BLOCK_BYTES)

    h_tiled = TH < H
    grid = tuple(out_shape[:s]) + ((H // TH,) if h_tiled else ())
    n_lead_grid = s
    pos_of_input_dim = [perm.index(d) for d in range(s)]
    folded = tuple(x.shape[s:lead])  # identity-mapped leading dims, taken whole
    block = (None,) * s + folded + (TH, W)

    def in_map(*g):
        lead_idx = tuple(g[pos_of_input_dim[d]] for d in range(s))
        h_idx = (g[n_lead_grid],) if h_tiled else (0,)
        return lead_idx + (0,) * (lead - s) + h_idx + (0,)

    def out_map(*g):
        lead_idx = tuple(g[:s])
        h_idx = (g[n_lead_grid],) if h_tiled else (0,)
        return lead_idx + (0,) * (lead - s) + h_idx + (0,)

    return pl.pallas_call(
        _copy_kernel,
        out_shape=jax.ShapeDtypeStruct(out_shape, x.dtype),
        grid=grid,
        in_specs=[pl.BlockSpec(block, in_map)],
        out_specs=pl.BlockSpec(block, out_map),
        compiler_params=_compiler_params(len(grid)),
        cost_estimate=_cost(x),
    )(x)


def _batched_transpose(x3):
    """x3: (B, M, N) -> (B, N, M), tiled to ~1 MiB blocks and pipelined."""
    B, M, N = x3.shape
    itemsize = x3.dtype.itemsize
    be = max(1, _BLOCK_BYTES // itemsize)  # elements per block budget
    if M * N <= be:
        TM, TN = M, N
    else:
        TM = M if M * _LANE <= be else _tile128(M, max(_LANE, be // _LANE))
        TN = _tile128(N, max(_LANE, be // TM))
    grid = (B, M // TM, N // TN)
    return pl.pallas_call(
        _t2d_kernel,
        out_shape=jax.ShapeDtypeStruct((B, N, M), x3.dtype),
        grid=grid,
        in_specs=[pl.BlockSpec((None, TM, TN), lambda b, i, j: (b, i, j))],
        out_specs=pl.BlockSpec((None, TN, TM), lambda b, i, j: (b, j, i)),
        compiler_params=_compiler_params(3),
        cost_estimate=_cost(x3),
    )(x3)


def _to_last_lane_dense(x3, out_shape, B, M, K, W):
    """movedim(a, -1) with small M: lane-dense (.., K, W*M) output blocks."""
    itemsize = x3.dtype.itemsize
    row_bytes = M * W * itemsize
    kmax = max(1, _BLOCK_BYTES // row_bytes)
    if K <= kmax:
        TK = K
    else:
        TK = None
        for t in range(_SUBLANE, kmax + 1, _SUBLANE):
            if K % t == 0 and (t * W) % _LANE == 0:
                TK = t
        if TK is None:
            TK = K  # no aligned divisor: take the whole extent
    grid = (B, K // TK)
    out2 = pl.pallas_call(
        _dense_kernel,
        out_shape=jax.ShapeDtypeStruct((B, K, W * M), x3.dtype),
        grid=grid,
        in_specs=[pl.BlockSpec((None, M, TK * W), lambda b, k: (b, 0, k))],
        out_specs=pl.BlockSpec((None, TK, W * M), lambda b, k: (b, k, 0)),
        compiler_params=_compiler_params(2),
        cost_estimate=_cost(x3),
    )(x3)
    return out2.reshape(out_shape)


def _move_to_last(x, a):
    """x.movedim(a, -1): batched transpose of the 3-D view (B, M, K*W)."""
    pre, M, post = x.shape[:a], x.shape[a], x.shape[a + 1:]
    out_shape = pre + post + (M,)
    B, K, W = _prod(pre), _prod(post[:-1]), post[-1]
    x3 = x.reshape(B, M, K * W)
    if M < _LANE:
        # Moved dim is narrower than a lane register: a plain transpose would
        # emit masked width-M stores, so try the lane-dense relayout first.
        try:
            return _to_last_lane_dense(x3, out_shape, B, M, K, W)
        except Exception:
            # TODO(synk): lane-dense (c,h,w)->(h,(w c)) shape cast rejected by
            # this Mosaic build; fall back to the lane-sparse batched transpose.
            pass
    return _batched_transpose(x3).reshape(out_shape)


def _move_from_last(x, b):
    """x.movedim(-1, b): batched transpose of the 3-D view (B, P, W)."""
    nd = x.ndim
    W = x.shape[-1]
    pre, mid = x.shape[:b], x.shape[b:nd - 1]
    out_shape = pre + (W,) + mid
    x3 = x.reshape(_prod(pre), _prod(mid), W)
    return _batched_transpose(x3).reshape(out_shape)


def movedim_pallas(x, a, b):
    nd = x.ndim
    a %= nd
    b %= nd
    perm = _movedim_perm(nd, a, b)
    if perm == tuple(range(nd)):
        return x
    if perm[-2:] == (nd - 2, nd - 1):
        return _leading_permute(x, perm)
    if b == nd - 1:
        return _move_to_last(x, a)
    if a == nd - 1:
        return _move_from_last(x, b)
    # TODO(synk): permutations that move only the second-minor dim while keeping
    # the minor dim fixed (e.g. 4-D movedim(1, 2)) are not implemented in Pallas.
    raise NotImplementedError(f"movedim perm {perm} not implemented in Pallas")


class MoveDim:
    """Pallas equivalent of the PyTorch MoveDim(a, b) module."""

    def __init__(self, a, b):
        self.a = a
        self.b = b

    def __call__(self, x):
        return movedim_pallas(x, self.a, self.b)


if __name__ == "__main__":
    key = jax.random.PRNGKey(0)

    # NCHW input: batch=2, channels=4, H=16, W=128 (lane-friendly last dim).
    x = jax.random.normal(key, (2, 4, 16, 128), dtype=jnp.float32)

    # Canonical case: movedim(1, 3) == NCHW -> NHWC (lane-dense batched transpose).
    y = jax.block_until_ready(MoveDim(1, 3)(x))
    ref = jnp.moveaxis(x, 1, 3)
    assert y.shape == ref.shape == (2, 16, 128, 4)
    assert jnp.array_equal(y, ref), "movedim(1,3) mismatch"

    # Leading-dim case: movedim(0, 1) == (N,C,H,W) -> (C,N,H,W) (copy kernel).
    y2 = jax.block_until_ready(MoveDim(0, 1)(x))
    assert jnp.array_equal(y2, jnp.moveaxis(x, 0, 1)), "movedim(0,1) mismatch"

    # Minor dim moved up front: movedim(3, 1) == NHWC -> NCHW.
    xh = jnp.moveaxis(x, 1, 3)
    y3 = jax.block_until_ready(MoveDim(3, 1)(xh))
    assert jnp.array_equal(y3, jnp.moveaxis(xh, 3, 1)), "movedim(3,1) mismatch"

    # Plain (tiled, pipelined) 2-D transpose.
    x2d = jax.random.normal(key, (256, 384), dtype=jnp.float32)
    y4 = jax.block_until_ready(MoveDim(0, 1)(x2d))
    assert jnp.array_equal(y4, x2d.T), "2-D transpose mismatch"

    print("KERNEL_OK")
</pallas_src>

<mosaic_0001>
module attributes {stable_mosaic.version = 11 : i64} {
  func.func @_dense_kernel(%arg0: i32, %arg1: i32, %arg2: memref<1x4x2048xf32, #tpu.memory_space<vmem>>, %arg3: memref<1x16x512xf32, #tpu.memory_space<vmem>>) attributes {dimension_semantics = [#tpu.dimension_semantics<parallel>, #tpu.dimension_semantics<parallel>], iteration_bounds = array<i64: 2, 1>, scalar_prefetch = 0 : i64, scratch_operands = 0 : i64, tpu.core_type = #tpu.core_type<tc>, window_params = [{transform_indices = @transform_0, window_bounds = array<i64: 1, 4, 2048>}, {transform_indices = @transform_1, window_bounds = array<i64: 1, 16, 512>}]} {
    %c0 = arith.constant 0 : index
    %c0_0 = arith.constant 0 : index
    %c0_1 = arith.constant 0 : index
    %0 = vector.load %arg2[%c0, %c0_0, %c0_1] : memref<1x4x2048xf32, #tpu.memory_space<vmem>>, vector<1x4x2048xf32>
    %1 = vector.shape_cast %0 : vector<1x4x2048xf32> to vector<4x2048xf32>
    %2 = tpu.transpose %1, [1, 0] : vector<4x2048xf32> -> vector<2048x4xf32>
    %3 = vector.shape_cast %2 : vector<2048x4xf32> to vector<16x512xf32>
    %c0_2 = arith.constant 0 : index
    %c0_3 = arith.constant 0 : index
    %c0_4 = arith.constant 0 : index
    %4 = vector.load %arg3[%c0_2, %c0_3, %c0_4] : memref<1x16x512xf32, #tpu.memory_space<vmem>>, vector<1x16x512xf32>
    %5 = vector.shape_cast %4 : vector<1x16x512xf32> to vector<16x512xf32>
    %6 = vector.shape_cast %3 : vector<16x512xf32> to vector<1x16x512xf32>
    tpu.vector_store %arg3[%c0_2, %c0_3, %c0_4], %6 {strides = array<i32>} : memref<1x16x512xf32, #tpu.memory_space<vmem>>, vector<1x16x512xf32>,
    return
  }
  func.func @transform_0(%arg0: i32, %arg1: i32) -> (i32, i32, i32) {
    %c0_i32 = arith.constant 0 : i32
    %c0_i32_0 = arith.constant 0 : i32
    return %arg0, %c0_i32, %arg1 : i32, i32, i32
  }
  func.func @transform_1(%arg0: i32, %arg1: i32) -> (i32, i32, i32) {
    %c0_i32 = arith.constant 0 : i32
    %c0_i32_0 = arith.constant 0 : i32
    return %arg0, %arg1, %c0_i32 : i32, i32, i32
  }
}

module attributes {stable_mosaic.version = 11 : i64} {
  func.func @_t2d_kernel(%arg0: i32, %arg1: i32, %arg2: i32, %arg3: memref<1x4x2048xf32, #tpu.memory_space<vmem>>, %arg4: memref<1x2048x4xf32, #tpu.memory_space<vmem>>) attributes {dimension_semantics = [#tpu.dimension_semantics<parallel>, #tpu.dimension_semantics<parallel>, #tpu.dimension_semantics<parallel>], iteration_bounds = array<i64: 2, 1, 1>, scalar_prefetch = 0 : i64, scratch_operands = 0 : i64, tpu.core_type = #tpu.core_type<tc>, window_params = [{transform_indices = @transform_0, window_bounds = array<i64: 1, 4, 2048>}, {transform_indices = @transform_1, window_bounds = array<i64: 1, 2048, 4>}]} {
    %c0 = arith.constant 0 : index
    %c0_0 = arith.constant 0 : index
    %c0_1 = arith.constant 0 : index
    %0 = vector.load %arg3[%c0, %c0_0, %c0_1] : memref<1x4x2048xf32, #tpu.memory_space<vmem>>, vector<1x4x2048xf32>
    %1 = vector.shape_cast %0 : vector<1x4x2048xf32> to vector<4x2048xf32>
    %2 = tpu.transpose %1, [1, 0] : vector<4x2048xf32> -> vector<2048x4xf32>
    %c0_2 = arith.constant 0 : index
    %c0_3 = arith.constant 0 : index
    %c0_4 = arith.constant 0 : index
    %3 = vector.load %arg4[%c0_2, %c0_3, %c0_4] : memref<1x2048x4xf32, #tpu.memory_space<vmem>>, vector<1x2048x4xf32>
    %4 = vector.shape_cast %3 : vector<1x2048x4xf32> to vector<2048x4xf32>
    %5 = vector.shape_cast %2 : vector<2048x4xf32> to vector<1x2048x4xf32>
    tpu.vector_store %arg4[%c0_2, %c0_3, %c0_4], %5 {strides = array<i32>} : memref<1x2048x4xf32, #tpu.memory_space<vmem>>, vector<1x2048x4xf32>,
    return
  }
  func.func @transform_0(%arg0: i32, %arg1: i32, %arg2: i32) -> (i32, i32, i32) {
    %c0_i32 = arith.constant 0 : i32
    return %arg0, %arg1, %arg2 : i32, i32, i32
  }
  func.func @transform_1(%arg0: i32, %arg1: i32, %arg2: i32) -> (i32, i32, i32) {
    %c0_i32 = arith.constant 0 : i32
    return %arg0, %arg2, %arg1 : i32, i32, i32
  }
}

</mosaic_0001>

<bundles_post_ra>
// kernel: tpu_custom_call.1
= control target key start
LH: loop header
LB: loop body
LE: loop exit
PB: predicated region body
PF: predicated region fallthrough
CT: control target
= control target key end

     0   :  { %6 = vsyncpa [#allocation3], 0  ;;  %s1914_s0 = inlined_call_operand.hbm [shape: f32[2,4,2048], index: 0, kind: input, shape index: {}]   ;;  %s1915_s1 = inlined_call_operand.vmem [shape: f32[2,2048,4], index: 1, kind: output, shape index: {}]  }
   0x1   :  { %8 = vsyncpa [#allocation3 + $0x1], 0  ;;  %s1265_s6 = smov 0   ;;  %s1267_s7 = smov 0  }
   0x2   :  { %s1269_s8 = smov 0   ;;  %s1271_s9 = smov 0  }
   0x3   :  { %s1273_s10 = smov 0   ;;  %s1275_s11 = smov 0  }
   0x4 LB: > { %s1093_s12 = sadd.s32 4294967295, %s1252_s11   ;;  %s33_s13 = sadd.s32 1, %s1248_s10  ;;  %s1252_s11 = sphi %s1275_s11, %s14_s11   ;;  %s1248_s10 = sphi %s1273_s10, %s1925_s10   ;;  %s1244_s9 = sphi %s1271_s9, %s1924_s9   ;;  %s1240_s8 = sphi %s1269_s8, %s1923_s8   ;;  %s1236_s7 = sphi %s1267_s7, %s1922_s7   ;;  %s1232_s6 = sphi %s1265_s6, %s1921_s6  }
   0x5   : > { %p35_p0 = scmp.ge.s32.totalorder %s33_s13, 2  ;;  %s44_s14 = sadd.s32 1, %s1240_s8 }
   0x6   : > { %p51_p1 = scmp.ne.s32.totalorder %s1240_s8, %s1236_s7  ;;  %p52_p2 = scmp.eq.s32.totalorder %s1252_s11, 0 }
   0x7   : > { %s1927_s13 = smov (%p35_p0, %s33_s13), 0  ;;  %p57_p4 = scmp.ne.s32.totalorder %s1236_s7, %s1232_s6 }
   0x8   : > { %p1301_p3 = por %p52_p2, %p51_p1  ;;  %s37_s16 = ssub.s32 %s1248_s10, %s1927_s13 }
   0x9   : > { %p58_p5 = scmp.eq.s32.totalorder %s1093_s12, 0  ;;  %p42_p6 = scmp.eq.s32.totalorder %s37_s16, 0 }
   0xa   : > { %p1114_p8 = scmp.lt.s32.totalorder %s1252_s11, 2  ;;  %s111_s19 = sand.u32 1, %s1240_s8  }
   0xb   : > { %p1308_p7 = por %p58_p5, %p57_p4  ;;  %s1106_s20 = sshll.u32 %s1248_s10, 10 }
   0xc   : > { %s1314_s18 = scalar_select %p42_p6, %s1240_s8, %s44_s14  }
   0xd   : > { %s1097_s21 = sshll.u32 %s111_s19, 6  ;;  %s1321_s24 = scalar_lea.hbm %s1914_s0, %s1106_s20 }
   0xe   : > { %s115_s25 = scalar_lea.vmem [#allocation2], %s1097_s21  ;;  %p1325_p9 = pnand %p1114_p8, %p1301_p3 }
   0xf   : > { %s127_s26 = sshll.u32 %s115_s25, 4  ;;  %s112_s28 = scalar_lea.sflag [#allocation3], %s111_s19  ;;  %s1329_s26 = int_to_ptr.vmem [resolvable:$true] %s127_s26 }
  0x10   : > { %s1172_s29 = scalar_lea.hbm %s1321_s24, 1024  ;;  %p1174_p13 = pneg %p1325_p9 }
  0x11   : > { %p1173_p12 = scmp.ne.s32.totalorder %s1321_s24, %s1172_s29  ;;  %s1177_s3 = scalar_lea.hbm %s1914_s0, 2048 }
  0x12   : > { %p1178_p2 = scmp.lt.u32.totalorder %s1321_s24, %s1914_s0  ;;  %p1179_p3 = scmp.lt.u32.totalorder %s1177_s3, %s1172_s29 }
  0x13   : > { %p1175_p0 = pnand %p1174_p13, %p1173_p12  ;;  %p1181_p5 = scmp.lt.u32.totalorder %s1172_s29, %s1321_s24 }
  0x14   : > { %p1180_p4 = por %p1179_p3, %p1178_p2 }
  0x15   : > { %p1176_p1 = pneg %p1175_p0 }
  0x16   : > { %p1182_p6 = por %p1181_p5, %p1180_p4 }
  0x18   : > { %p1183_p8 = pnand %p1182_p6, %p1176_p1 }
  0x1a   : > { %1186 = shalt.err (!%p1183_p8)
}
  0x1b   : > { %s1187_s6 = scalar_lea.vmem %s1329_s26, 1024  ;;  %s1254_s12 = smov [#allocation2]  }
  0x1c   : > { %p1188_p12 = scmp.ne.s32.totalorder %s1329_s26, %s1187_s6  ;;  %s1192_s14 = sshll.u32 %s1254_s12, 4  ;;  %s1193_s14 = int_to_ptr.vmem [resolvable:$false] %s1192_s14 }
  0x1d   : > { %s1194_s15 = scalar_lea.vmem %s1193_s14, 2048  ;;  %p1195_p11 = scmp.lt.s32.totalorder %s1329_s26, %s1193_s14 }
  0x1e   : > { %p1190_p0 = pnand %p1188_p12, %p1174_p13  ;;  %p1196_p2 = scmp.lt.s32.totalorder %s1194_s15, %s1187_s6 }
  0x20   : > { %p1191_p10 = pneg %p1190_p0  ;;  %p1197_p3 = por %p1196_p2, %p1195_p11 }
  0x22   : > { %p1198_p4 = pnand %p1197_p3, %p1191_p10 }
  0x24   : > { %1201 = shalt.err (!%p1198_p4)
}
  0x25   : > { %1113 = dma.hbm_to_vmem [thread:$0]  (!%p1325_p9), %s1321_s24, 1024, %s1329_s26, %s112_s28  }
  0x26   : > { %p1919_p1 = scmp.lt.s32.totalorder %s1252_s11, 3  ;;  %p1920_p5 = scmp.ge.s32.totalorder %s1252_s11, 1 }
  0x28   : > { %p133_p13 = pnand %p1920_p5, %p1919_p1 }
  0x29   : > { %s138_s16 = sand.u32 (!%p133_p13), 1, %s1236_s7  }
  0x2a   : > { %136 = sbr.rel (%p133_p13) target bundleno = 689 (0x2b1), region = 24  ;;  %s1101_s19 = sshll.u32 (!%p133_p13), %s138_s16, 6 }
  0x2b   : > { %s139_s20 = scalar_lea.sflag (!%p133_p13), [#allocation3], %s138_s16  ;;  %s1363_s21 = scalar_lea.vmem (!%p133_p13), [#allocation2], %s1101_s19 }
  0x31   : > { %1227 = dma.done.wait (%p1308_p7), %s139_s20, 1024  }
  0x32   : > { %1229 = vsyncadd (%p1308_p7), %s139_s20, 4294966272  ;;  %v183_v0 = vld [vmem:[%s1363_s21 + $0x8] sm:$0xff]  ;;  %v182_v1 = vld [vmem:[%s1363_s21] sm:$0xff]  ;;  %p170_p9 = scmp.lt.s32.totalorder %s1244_s9, 1  ;;  %vm726_vm0 = vcmask 31744  }
  0x33   : > { %278 = vxpose.xlu1.b32.start.end [1/1] (short) %v183_v0, 128  ;;  %214 = vxpose.xlu0.b32.start.end [1/1] (short) %v182_v1, 128  ;;  %v199_v2 = vcombine.high %v183_v0, %v183_v0  ;;  %v198_v3 = vcombine.high %v182_v1, %v182_v1  ;;  %v184_v4 = vld [vmem:[%s1363_s21 + $0x10] sm:$0xff]  ;;  %v185_v32 = vld [vmem:[%s1363_s21 + $0x18] sm:$0xff] }
  0x34   : > { %v200_v5 = vcombine.high %v184_v4, %v184_v4  ;;  %s1929_s9 = smov (!%p170_p9, %s1244_s9), 1  ;;  %v201_v35 = vcombine.high %v185_v32, %v185_v32 }
  0x35   : > { %s1107_s17 = sshll.u32 %s1929_s9, 11 }
  0x36   : > { %s1377_s24 = scalar_lea.vmem %s1915_s1, %s1107_s17 }
  0x70   : > { %310 = vxpose.xlu1.b32.start.end [1/1] (short) %v199_v2, 128  ;;  %246 = vxpose.xlu0.b32.start.end [1/1] (short) %v198_v3, 128  ;;  %v186_v2 = vld [vmem:[%s1363_s21 + $0x20] sm:$0xff] }
  0xad   : > { %374 = vxpose.xlu1.b32.start.end [1/1] (short) %v200_v5, 128  ;;  %342 = vxpose.xlu0.b32.start.end [1/1] (short) %v184_v4, 128  ;;  %v202_v5 = vcombine.high %v186_v2, %v186_v2 }
  0xb3   : > { %v294_v6 = vpop.trf.xlu1  ;;  %v230_v7 = vpop.trf.xlu0 }
  0xb4   : > { %759 = vst.msk [vmem:[%s1377_s24 + $0x100] sm:$0xff] %vm726_vm0, %v294_v6  ;;  %727 = vst.msk [vmem:[%s1377_s24] sm:$0xff] %vm726_vm0, %v230_v7 }
  0xb7   : > { %v295_v8 = vpop.trf.xlu1  ;;  %v231_v9 = vpop.trf.xlu0 }
  0xb8   : > { %760 = vst.msk [vmem:[%s1377_s24 + $0x108] sm:$0xff] %vm726_vm0, %v295_v8  ;;  %728 = vst.msk [vmem:[%s1377_s24 + $0x8] sm:$0xff] %vm726_vm0, %v231_v9 }
  0xbb   : > { %v296_v10 = vpop.trf.xlu1  ;;  %v232_v11 = vpop.trf.xlu0 }
  0xbc   : > { %761 = vst.msk [vmem:[%s1377_s24 + $0x110] sm:$0xff] %vm726_vm0, %v296_v10  ;;  %729 = vst.msk [vmem:[%s1377_s24 + $0x10] sm:$0xff] %vm726_vm0, %v232_v11 }
  0xbf   : > { %v297_v12 = vpop.trf.xlu1  ;;  %v233_v13 = vpop.trf.xlu0 }
  0xc0   : > { %762 = vst.msk [vmem:[%s1377_s24 + $0x118] sm:$0xff] %vm726_vm0, %v297_v12  ;;  %730 = vst.msk [vmem:[%s1377_s24 + $0x18] sm:$0xff] %vm726_vm0, %v233_v13 }
  0xc3   : > { %v298_v14 = vpop.trf.xlu1  ;;  %v234_v15 = vpop.trf.xlu0 }
  0xc4   : > { %763 = vst.msk [vmem:[%s1377_s24 + $0x120] sm:$0xff] %vm726_vm0, %v298_v14  ;;  %731 = vst.msk [vmem:[%s1377_s24 + $0x20] sm:$0xff] %vm726_vm0, %v234_v15 }
  0xc7   : > { %v299_v16 = vpop.trf.xlu1  ;;  %v235_v17 = vpop.trf.xlu0 }
  0xc8   : > { %764 = vst.msk [vmem:[%s1377_s24 + $0x128] sm:$0xff] %vm726_vm0, %v299_v16  ;;  %732 = vst.msk [vmem:[%s1377_s24 + $0x28] sm:$0xff] %vm726_vm0, %v235_v17 }
  0xcb   : > { %v300_v18 = vpop.trf.xlu1  ;;  %v236_v19 = vpop.trf.xlu0 }
  0xcc   : > { %765 = vst.msk [vmem:[%s1377_s24 + $0x130] sm:$0xff] %vm726_vm0, %v300_v18  ;;  %733 = vst.msk [vmem:[%s1377_s24 + $0x30] sm:$0xff] %vm726_vm0, %v236_v19 }
  0xcf   : > { %v301_v20 = vpop.trf.xlu1  ;;  %v237_v21 = vpop.trf.xlu0 }
  0xd0   : > { %766 = vst.msk [vmem:[%s1377_s24 + $0x138] sm:$0xff] %vm726_vm0, %v301_v20  ;;  %734 = vst.msk [vmem:[%s1377_s24 + $0x38] sm:$0xff] %vm726_vm0, %v237_v21 }
  0xd3   : > { %v302_v22 = vpop.trf.xlu1  ;;  %v238_v23 = vpop.trf.xlu0 }
  0xd4   : > { %767 = vst.msk [vmem:[%s1377_s24 + $0x140] sm:$0xff] %vm726_vm0, %v302_v22  ;;  %735 = vst.msk [vmem:[%s1377_s24 + $0x40] sm:$0xff] %vm726_vm0, %v238_v23 }
  0xd7   : > { %v303_v24 = vpop.trf.xlu1  ;;  %v239_v25 = vpop.trf.xlu0 }
  0xd8   : > { %768 = vst.msk [vmem:[%s1377_s24 + $0x148] sm:$0xff] %vm726_vm0, %v303_v24  ;;  %736 = vst.msk [vmem:[%s1377_s24 + $0x48] sm:$0xff] %vm726_vm0, %v239_v25 }
  0xdb   : > { %v304_v26 = vpop.trf.xlu1  ;;  %v240_v27 = vpop.trf.xlu0 }
  0xdc   : > { %769 = vst.msk [vmem:[%s1377_s24 + $0x150] sm:$0xff] %vm726_vm0, %v304_v26  ;;  %737 = vst.msk [vmem:[%s1377_s24 + $0x50] sm:$0xff] %vm726_vm0, %v240_v27 }
  0xdf   : > { %v305_v28 = vpop.trf.xlu1  ;;  %v241_v29 = vpop.trf.xlu0 }
  0xe0   : > { %770 = vst.msk [vmem:[%s1377_s24 + $0x158] sm:$0xff] %vm726_vm0, %v305_v28  ;;  %738 = vst.msk [vmem:[%s1377_s24 + $0x58] sm:$0xff] %vm726_vm0, %v241_v29 }
  0xe3   : > { %v306_v30 = vpop.trf.xlu1  ;;  %v242_v31 = vpop.trf.xlu0 }
  0xe4   : > { %771 = vst.msk [vmem:[%s1377_s24 + $0x160] sm:$0xff] %vm726_vm0, %v306_v30  ;;  %739 = vst.msk [vmem:[%s1377_s24 + $0x60] sm:$0xff] %vm726_vm0, %v242_v31 }
  0xe7   : > { %v307_v33 = vpop.trf.xlu1  ;;  %v243_v34 = vpop.trf.xlu0 }
  0xe8   : > { %772 = vst.msk [vmem:[%s1377_s24 + $0x168] sm:$0xff] %vm726_vm0, %v307_v33  ;;  %740 = vst.msk [vmem:[%s1377_s24 + $0x68] sm:$0xff] %vm726_vm0, %v243_v34 }
  0xeb   : > { %v308_v36 = vpop.trf.xlu1  ;;  %v244_v37 = vpop.trf.xlu0  ;;  %438 = vxpose.xlu1.b32.start.end [1/1] (short) %v201_v35, 128  ;;  %406 = vxpose.xlu0.b32.start.end [1/1] (short) %v185_v32, 128 }
  0xec   : > { %773 = vst.msk [vmem:[%s1377_s24 + $0x170] sm:$0xff] %vm726_vm0, %v308_v36  ;;  %741 = vst.msk [vmem:[%s1377_s24 + $0x70] sm:$0xff] %vm726_vm0, %v244_v37  ;;  %v187_v36 = vld [vmem:[%s1363_s21 + $0x28] sm:$0xff] }
  0xef   : > { %v309_v38 = vpop.trf.xlu1  ;;  %v245_v39 = vpop.trf.xlu0 }
  0xf0   : > { %774 = vst.msk [vmem:[%s1377_s24 + $0x178] sm:$0xff] %vm726_vm0, %v309_v38  ;;  %742 = vst.msk [vmem:[%s1377_s24 + $0x78] sm:$0xff] %vm726_vm0, %v245_v39  ;;  %v203_v39 = vcombine.high %v187_v36, %v187_v36 }
  0xf3   : > { %v326_v40 = vpop.trf.xlu1  ;;  %v262_v41 = vpop.trf.xlu0 }
  0xf4   : > { %775 = vst.msk [vmem:[%s1377_s24 + $0x180] sm:$0xff] %vm726_vm0, %v326_v40  ;;  %743 = vst.msk [vmem:[%s1377_s24 + $0x80] sm:$0xff] %vm726_vm0, %v262_v41 }
  0xf7   : > { %v327_v42 = vpop.trf.xlu1  ;;  %v263_v43 = vpop.trf.xlu0 }
  0xf8   : > { %776 = vst.msk [vmem:[%s1377_s24 + $0x188] sm:$0xff] %vm726_vm0, %v327_v42  ;;  %744 = vst.msk [vmem:[%s1377_s24 + $0x88] sm:$0xff] %vm726_vm0, %v263_v43 }
  0xfb   : > { %v328_v44 = vpop.trf.xlu1  ;;  %v264_v45 = vpop.trf.xlu0 }
  0xfc   : > { %777 = vst.msk [vmem:[%s1377_s24 + $0x190] sm:$0xff] %vm726_vm0, %v328_v44  ;;  %745 = vst.msk [vmem:[%s1377_s24 + $0x90] sm:$0xff] %vm726_vm0, %v264_v45 }
  0xff   : > { %v329_v46 = vpop.trf.xlu1  ;;  %v265_v47 = vpop.trf.xlu0 }
 0x100   : > { %778 = vst.msk [vmem:[%s1377_s24 + $0x198] sm:$0xff] %vm726_vm0, %v329_v46  ;;  %746 = vst.msk [vmem:[%s1377_s24 + $0x98] sm:$0xff] %vm726_vm0, %v265_v47 }
 0x103   : > { %v330_v48 = vpop.trf.xlu1  ;;  %v266_v49 = vpop.trf.xlu0 }
 0x104   : > { %779 = vst.msk [vmem:[%s1377_s24 + $0x1a0] sm:$0xff] %vm726_vm0, %v330_v48  ;;  %747 = vst.msk [vmem:[%s1377_s24 + $0xa0] sm:$0xff] %vm726_vm0, %v266_v49 }
 0x107   : > { %v331_v50 = vpop.trf.xlu1  ;;  %v267_v51 = vpop.trf.xlu0 }
 0x108   : > { %780 = vst.msk [vmem:[%s1377_s24 + $0x1a8] sm:$0xff] %vm726_vm0, %v331_v50  ;;  %748 = vst.msk [vmem:[%s1377_s24 + $0xa8] sm:$0xff] %vm726_vm0, %v267_v51 }
 0x10b   : > { %v332_v52 = vpop.trf.xlu1  ;;  %v268_v53 = vpop.trf.xlu0 }
 0x10c   : > { %781 = vst.msk [vmem:[%s1377_s24 + $0x1b0] sm:$0xff] %vm726_vm0, %v332_v52  ;;  %749 = vst.msk [vmem:[%s1377_s24 + $0xb0] sm:$0xff] %vm726_vm0, %v268_v53 }
 0x10f   : > { %v333_v54 = vpop.trf.xlu1  ;;  %v269_v55 = vpop.trf.xlu0 }
 0x110   : > { %782 = vst.msk [vmem:[%s1377_s24 + $0x1b8] sm:$0xff] %vm726_vm0, %v333_v54  ;;  %750 = vst.msk [vmem:[%s1377_s24 + $0xb8] sm:$0xff] %vm726_vm0, %v269_v55 }
 0x113   : > { %v334_v56 = vpop.trf.xlu1  ;;  %v270_v57 = vpop.trf.xlu0 }
 0x114   : > { %783 = vst.msk [vmem:[%s1377_s24 + $0x1c0] sm:$0xff] %vm726_vm0, %v334_v56  ;;  %751 = vst.msk [vmem:[%s1377_s24 + $0xc0] sm:$0xff] %vm726_vm0, %v270_v57 }
 0x117   : > { %v335_v58 = vpop.trf.xlu1  ;;  %v271_v59 = vpop.trf.xlu0 }
 0x118   : > { %784 = vst.msk [vmem:[%s1377_s24 + $0x1c8] sm:$0xff] %vm726_vm0, %v335_v58  ;;  %752 = vst.msk [vmem:[%s1377_s24 + $0xc8] sm:$0xff] %vm726_vm0, %v271_v59 }
 0x11b   : > { %v336_v60 = vpop.trf.xlu1  ;;  %v272_v61 = vpop.trf.xlu0 }
 0x11c   : > { %785 = vst.msk [vmem:[%s1377_s24 + $0x1d0] sm:$0xff] %vm726_vm0, %v336_v60  ;;  %753 = vst.msk [vmem:[%s1377_s24 + $0xd0] sm:$0xff] %vm726_vm0, %v272_v61 }
 0x11f   : > { %v337_v62 = vpop.trf.xlu1  ;;  %v273_v63 = vpop.trf.xlu0 }
 0x120   : > { %786 = vst.msk [vmem:[%s1377_s24 + $0x1d8] sm:$0xff] %vm726_vm0, %v337_v62  ;;  %754 = vst.msk [vmem:[%s1377_s24 + $0xd8] sm:$0xff] %vm726_vm0, %v273_v63 }
 0x123   : > { %v338_v0 = vpop.trf.xlu1  ;;  %v274_v1 = vpop.trf.xlu0 }
 0x124   : > { %787 = vst.msk [vmem:[%s1377_s24 + $0x1e0] sm:$0xff] %vm726_vm0, %v338_v0  ;;  %755 = vst.msk [vmem:[%s1377_s24 + $0xe0] sm:$0xff] %vm726_vm0, %v274_v1 }
 0x127   : > { %v339_v3 = vpop.trf.xlu1  ;;  %v275_v4 = vpop.trf.xlu0 }
 0x128   : > { %788 = vst.msk [vmem:[%s1377_s24 + $0x1e8] sm:$0xff] %vm726_vm0, %v339_v3  ;;  %756 = vst.msk [vmem:[%s1377_s24 + $0xe8] sm:$0xff] %vm726_vm0, %v275_v4 }
 0x12b   : > { %v340_v6 = vpop.trf.xlu1  ;;  %v276_v7 = vpop.trf.xlu0  ;;  %502 = vxpose.xlu1.b32.start.end [1/1] (short) %v202_v5, 128  ;;  %470 = vxpose.xlu0.b32.start.end [1/1] (short) %v186_v2, 128 }
 0x12c   : > { %789 = vst.msk [vmem:[%s1377_s24 + $0x1f0] sm:$0xff] %vm726_vm0, %v340_v6  ;;  %757 = vst.msk [vmem:[%s1377_s24 + $0xf0] sm:$0xff] %vm726_vm0, %v276_v7  ;;  %v188_v6 = vld [vmem:[%s1363_s21 + $0x30] sm:$0xff] }
 0x12f   : > { %v341_v8 = vpop.trf.xlu1  ;;  %v277_v9 = vpop.trf.xlu0 }
 0x130   : > { %790 = vst.msk [vmem:[%s1377_s24 + $0x1f8] sm:$0xff] %vm726_vm0, %v341_v8  ;;  %758 = vst.msk [vmem:[%s1377_s24 + $0xf8] sm:$0xff] %vm726_vm0, %v277_v9  ;;  %v204_v9 = vcombine.high %v188_v6, %v188_v6 }
 0x133   : > { %v390_v10 = vpop.trf.xlu1  ;;  %v358_v11 = vpop.trf.xlu0 }
 0x134   : > { %807 = vst.msk [vmem:[%s1377_s24 + $0x280] sm:$0xff] %vm726_vm0, %v390_v10  ;;  %791 = vst.msk [vmem:[%s1377_s24 + $0x200] sm:$0xff] %vm726_vm0, %v358_v11 }
 0x137   : > { %v391_v12 = vpop.trf.xlu1  ;;  %v359_v13 = vpop.trf.xlu0 }
 0x138   : > { %808 = vst.msk [vmem:[%s1377_s24 + $0x288] sm:$0xff] %vm726_vm0, %v391_v12  ;;  %792 = vst.msk [vmem:[%s1377_s24 + $0x208] sm:$0xff] %vm726_vm0, %v359_v13 }
 0x13b   : > { %v392_v14 = vpop.trf.xlu1  ;;  %v360_v15 = vpop.trf.xlu0 }
 0x13c   : > { %809 = vst.msk [vmem:[%s1377_s24 + $0x290] sm:$0xff] %vm726_vm0, %v392_v14  ;;  %793 = vst.msk [vmem:[%s1377_s24 + $0x210] sm:$0xff] %vm726_vm0, %v360_v15 }
 0x13f   : > { %v393_v16 = vpop.trf.xlu1  ;;  %v361_v17 = vpop.trf.xlu0 }
 0x140   : > { %810 = vst.msk [vmem:[%s1377_s24 + $0x298] sm:$0xff] %vm726_vm0, %v393_v16  ;;  %794 = vst.msk [vmem:[%s1377_s24 + $0x218] sm:$0xff] %vm726_vm0, %v361_v17 }
 0x143   : > { %v394_v18 = vpop.trf.xlu1  ;;  %v362_v19 = vpop.trf.xlu0 }
 0x144   : > { %811 = vst.msk [vmem:[%s1377_s24 + $0x2a0] sm:$0xff] %vm726_vm0, %v394_v18  ;;  %795 = vst.msk [vmem:[%s1377_s24 + $0x220] sm:$0xff] %vm726_vm0, %v362_v19 }
 0x147   : > { %v395_v20 = vpop.trf.xlu1  ;;  %v363_v21 = vpop.trf.xlu0 }
 0x148   : > { %812 = vst.msk [vmem:[%s1377_s24 + $0x2a8] sm:$0xff] %vm726_vm0, %v395_v20  ;;  %796 = vst.msk [vmem:[%s1377_s24 + $0x228] sm:$0xff] %vm726_vm0, %v363_v21 }
 0x14b   : > { %v396_v22 = vpop.trf.xlu1  ;;  %v364_v23 = vpop.trf.xlu0 }
 0x14c   : > { %813 = vst.msk [vmem:[%s1377_s24 + $0x2b0] sm:$0xff] %vm726_vm0, %v396_v22  ;;  %797 = vst.msk [vmem:[%s1377_s24 + $0x230] sm:$0xff] %vm726_vm0, %v364_v23 }
 0x14f   : > { %v397_v24 = vpop.trf.xlu1  ;;  %v365_v25 = vpop.trf.xlu0 }
 0x150   : > { %814 = vst.msk [vmem:[%s1377_s24 + $0x2b8] sm:$0xff] %vm726_vm0, %v397_v24  ;;  %798 = vst.msk [vmem:[%s1377_s24 + $0x238] sm:$0xff] %vm726_vm0, %v365_v25 }
 0x153   : > { %v398_v26 = vpop.trf.xlu1  ;;  %v366_v27 = vpop.trf.xlu0 }
 0x154   : > { %815 = vst.msk [vmem:[%s1377_s24 + $0x2c0] sm:$0xff] %vm726_vm0, %v398_v26  ;;  %799 = vst.msk [vmem:[%s1377_s24 + $0x240] sm:$0xff] %vm726_vm0, %v366_v27 }
 0x157   : > { %v399_v28 = vpop.trf.xlu1  ;;  %v367_v29 = vpop.trf.xlu0 }
 0x158   : > { %816 = vst.msk [vmem:[%s1377_s24 + $0x2c8] sm:$0xff] %vm726_vm0, %v399_v28  ;;  %800 = vst.msk [vmem:[%s1377_s24 + $0x248] sm:$0xff] %vm726_vm0, %v367_v29 }
 0x15b   : > { %v400_v30 = vpop.trf.xlu1  ;;  %v368_v31 = vpop.trf.xlu0 }
 0x15c   : > { %817 = vst.msk [vmem:[%s1377_s24 + $0x2d0] sm:$0xff] %vm726_vm0, %v400_v30  ;;  %801 = vst.msk [vmem:[%s1377_s24 + $0x250] sm:$0xff] %vm726_vm0, %v368_v31 }
 0x15f   : > { %v401_v32 = vpop.trf.xlu1  ;;  %v369_v33 = vpop.trf.xlu0 }
 0x160   : > { %818 = vst.msk [vmem:[%s1377_s24 + $0x2d8] sm:$0xff] %vm726_vm0, %v401_v32  ;;  %802 = vst.msk [vmem:[%s1377_s24 + $0x258] sm:$0xff] %vm726_vm0, %v369_v33 }
 0x163   : > { %v402_v34 = vpop.trf.xlu1  ;;  %v370_v35 = vpop.trf.xlu0 }
 0x164   : > { %819 = vst.msk [vmem:[%s1377_s24 + $0x2e0] sm:$0xff] %vm726_vm0, %v402_v34  ;;  %803 = vst.msk [vmem:[%s1377_s24 + $0x260] sm:$0xff] %vm726_vm0, %v370_v35 }
 0x167   : > { %v403_v37 = vpop.trf.xlu1  ;;  %v371_v38 = vpop.trf.xlu0 }
 0x168   : > { %820 = vst.msk [vmem:[%s1377_s24 + $0x2e8] sm:$0xff] %vm726_vm0, %v403_v37  ;;  %804 = vst.msk [vmem:[%s1377_s24 + $0x268] sm:$0xff] %vm726_vm0, %v371_v38 }
 0x16b   : > { %v404_v40 = vpop.trf.xlu1  ;;  %v372_v41 = vpop.trf.xlu0  ;;  %566 = vxpose.xlu1.b32.start.end [1/1] (short) %v203_v39, 128  ;;  %534 = vxpose.xlu0.b32.start.end [1/1] (short) %v187_v36, 128 }
 0x16c   : > { %821 = vst.msk [vmem:[%s1377_s24 + $0x2f0] sm:$0xff] %vm726_vm0, %v404_v40  ;;  %805 = vst.msk [vmem:[%s1377_s24 + $0x270] sm:$0xff] %vm726_vm0, %v372_v41  ;;  %v189_v40 = vld [vmem:[%s1363_s21 + $0x38] sm:$0xff] }
 0x16f   : > { %v405_v42 = vpop.trf.xlu1  ;;  %v373_v43 = vpop.trf.xlu0 }
 0x170   : > { %822 = vst.msk [vmem:[%s1377_s24 + $0x2f8] sm:$0xff] %vm726_vm0, %v405_v42  ;;  %806 = vst.msk [vmem:[%s1377_s24 + $0x278] sm:$0xff] %vm726_vm0, %v373_v43  ;;  %v205_v43 = vcombine.high %v189_v40, %v189_v40 }
 0x173   : > { %v454_v44 = vpop.trf.xlu1  ;;  %v422_v45 = vpop.trf.xlu0 }
 0x174   : > { %839 = vst.msk [vmem:[%s1377_s24 + $0x380] sm:$0xff] %vm726_vm0, %v454_v44  ;;  %823 = vst.msk [vmem:[%s1377_s24 + $0x300] sm:$0xff] %vm726_vm0, %v422_v45 }
 0x177   : > { %v455_v46 = vpop.trf.xlu1  ;;  %v423_v47 = vpop.trf.xlu0 }
 0x178   : > { %840 = vst.msk [vmem:[%s1377_s24 + $0x388] sm:$0xff] %vm726_vm0, %v455_v46  ;;  %824 = vst.msk [vmem:[%s1377_s24 + $0x308] sm:$0xff] %vm726_vm0, %v423_v47 }
 0x17b   : > { %v456_v48 = vpop.trf.xlu1  ;;  %v424_v49 = vpop.trf.xlu0 }
 0x17c   : > { %841 = vst.msk [vmem:[%s1377_s24 + $0x390] sm:$0xff] %vm726_vm0, %v456_v48  ;;  %825 = vst.msk [vmem:[%s1377_s24 + $0x310] sm:$0xff] %vm726_vm0, %v424_v49 }
 0x17f   : > { %v457_v50 = vpop.trf.xlu1  ;;  %v425_v51 = vpop.trf.xlu0 }
 0x180   : > { %842 = vst.msk [vmem:[%s1377_s24 + $0x398] sm:$0xff] %vm726_vm0, %v457_v50  ;;  %826 = vst.msk [vmem:[%s1377_s24 + $0x318] sm:$0xff] %vm726_vm0, %v425_v51 }
 0x183   : > { %v458_v52 = vpop.trf.xlu1  ;;  %v426_v53 = vpop.trf.xlu0 }
 0x184   : > { %843 = vst.msk [vmem:[%s1377_s24 + $0x3a0] sm:$0xff] %vm726_vm0, %v458_v52  ;;  %827 = vst.msk [vmem:[%s1377_s24 + $0x320] sm:$0xff] %vm726_vm0, %v426_v53 }
 0x187   : > { %v459_v54 = vpop.trf.xlu1  ;;  %v427_v55 = vpop.trf.xlu0 }
 0x188   : > { %844 = vst.msk [vmem:[%s1377_s24 + $0x3a8] sm:$0xff] %vm726_vm0, %v459_v54  ;;  %828 = vst.msk [vmem:[%s1377_s24 + $0x328] sm:$0xff] %vm726_vm0, %v427_v55 }
 0x18b   : > { %v460_v56 = vpop.trf.xlu1  ;;  %v428_v57 = vpop.trf.xlu0 }
 0x18c   : > { %845 = vst.msk [vmem:[%s1377_s24 + $0x3b0] sm:$0xff] %vm726_vm0, %v460_v56  ;;  %829 = vst.msk [vmem:[%s1377_s24 + $0x330] sm:$0xff] %vm726_vm0, %v428_v57 }
 0x18f   : > { %v461_v58 = vpop.trf.xlu1  ;;  %v429_v59 = vpop.trf.xlu0 }
 0x190   : > { %846 = vst.msk [vmem:[%s1377_s24 + $0x3b8] sm:$0xff] %vm726_vm0, %v461_v58  ;;  %830 = vst.msk [vmem:[%s1377_s24 + $0x338] sm:$0xff] %vm726_vm0, %v429_v59 }
 0x193   : > { %v462_v60 = vpop.trf.xlu1  ;;  %v430_v61 = vpop.trf.xlu0 }
 0x194   : > { %847 = vst.msk [vmem:[%s1377_s24 + $0x3c0] sm:$0xff] %vm726_vm0, %v462_v60  ;;  %831 = vst.msk [vmem:[%s1377_s24 + $0x340] sm:$0xff] %vm726_vm0, %v430_v61 }
 0x197   : > { %v463_v62 = vpop.trf.xlu1  ;;  %v431_v63 = vpop.trf.xlu0 }
 0x198   : > { %848 = vst.msk [vmem:[%s1377_s24 + $0x3c8] sm:$0xff] %vm726_vm0, %v463_v62  ;;  %832 = vst.msk [vmem:[%s1377_s24 + $0x348] sm:$0xff] %vm726_vm0, %v431_v63 }
 0x19b   : > { %v464_v0 = vpop.trf.xlu1  ;;  %v432_v1 = vpop.trf.xlu0 }
 0x19c   : > { %849 = vst.msk [vmem:[%s1377_s24 + $0x3d0] sm:$0xff] %vm726_vm0, %v464_v0  ;;  %833 = vst.msk [vmem:[%s1377_s24 + $0x350] sm:$0xff] %vm726_vm0, %v432_v1 }
 0x19f   : > { %v465_v2 = vpop.trf.xlu1  ;;  %v433_v3 = vpop.trf.xlu0 }
 0x1a0   : > { %850 = vst.msk [vmem:[%s1377_s24 + $0x3d8] sm:$0xff] %vm726_vm0, %v465_v2  ;;  %834 = vst.msk [vmem:[%s1377_s24 + $0x358] sm:$0xff] %vm726_vm0, %v433_v3 }
 0x1a3   : > { %v466_v4 = vpop.trf.xlu1  ;;  %v434_v5 = vpop.trf.xlu0 }
 0x1a4   : > { %851 = vst.msk [vmem:[%s1377_s24 + $0x3e0] sm:$0xff] %vm726_vm0, %v466_v4  ;;  %835 = vst.msk [vmem:[%s1377_s24 + $0x360] sm:$0xff] %vm726_vm0, %v434_v5 }
 0x1a7   : > { %v467_v7 = vpop.trf.xlu1  ;;  %v435_v8 = vpop.trf.xlu0 }
 0x1a8   : > { %852 = vst.msk [vmem:[%s1377_s24 + $0x3e8] sm:$0xff] %vm726_vm0, %v467_v7  ;;  %836 = vst.msk [vmem:[%s1377_s24 + $0x368] sm:$0xff] %vm726_vm0, %v435_v8 }
 0x1ab   : > { %v468_v10 = vpop.trf.xlu1  ;;  %v436_v11 = vpop.trf.xlu0  ;;  %630 = vxpose.xlu1.b32.start.end [1/1] (short) %v204_v9, 128  ;;  %598 = vxpose.xlu0.b32.start.end [1/1] (short) %v188_v6, 128 }
 0x1ac   : > { %853 = vst.msk [vmem:[%s1377_s24 + $0x3f0] sm:$0xff] %vm726_vm0, %v468_v10  ;;  %837 = vst.msk [vmem:[%s1377_s24 + $0x370] sm:$0xff] %vm726_vm0, %v436_v11 }
 0x1af   : > { %v469_v12 = vpop.trf.xlu1  ;;  %v437_v13 = vpop.trf.xlu0 }
 0x1b0   : > { %854 = vst.msk [vmem:[%s1377_s24 + $0x3f8] sm:$0xff] %vm726_vm0, %v469_v12  ;;  %838 = vst.msk [vmem:[%s1377_s24 + $0x378] sm:$0xff] %vm726_vm0, %v437_v13 }
 0x1b3   : > { %v518_v14 = vpop.trf.xlu1  ;;  %v486_v15 = vpop.trf.xlu0 }
 0x1b4   : > { %871 = vst.msk [vmem:[%s1377_s24 + $0x480] sm:$0xff] %vm726_vm0, %v518_v14  ;;  %855 = vst.msk [vmem:[%s1377_s24 + $0x400] sm:$0xff] %vm726_vm0, %v486_v15 }
 0x1b7   : > { %v519_v16 = vpop.trf.xlu1  ;;  %v487_v17 = vpop.trf.xlu0 }
 0x1b8   : > { %872 = vst.msk [vmem:[%s1377_s24 + $0x488] sm:$0xff] %vm726_vm0, %v519_v16  ;;  %856 = vst.msk [vmem:[%s1377_s24 + $0x408] sm:$0xff] %vm726_vm0, %v487_v17 }
 0x1bb   : > { %v520_v18 = vpop.trf.xlu1  ;;  %v488_v19 = vpop.trf.xlu0 }
 0x1bc   : > { %873 = vst.msk [vmem:[%s1377_s24 + $0x490] sm:$0xff] %vm726_vm0, %v520_v18  ;;  %857 = vst.msk [vmem:[%s1377_s24 + $0x410] sm:$0xff] %vm726_vm0, %v488_v19 }
 0x1bf   : > { %v521_v20 = vpop.trf.xlu1  ;;  %v489_v21 = vpop.trf.xlu0 }
 0x1c0   : > { %874 = vst.msk [vmem:[%s1377_s24 + $0x498] sm:$0xff] %vm726_vm0, %v521_v20  ;;  %858 = vst.msk [vmem:[%s1377_s24 + $0x418] sm:$0xff] %vm726_vm0, %v489_v21 }
 0x1c3   : > { %v522_v22 = vpop.trf.xlu1  ;;  %v490_v23 = vpop.trf.xlu0 }
 0x1c4   : > { %875 = vst.msk [vmem:[%s1377_s24 + $0x4a0] sm:$0xff] %vm726_vm0, %v522_v22  ;;  %859 = vst.msk [vmem:[%s1377_s24 + $0x420] sm:$0xff] %vm726_vm0, %v490_v23 }
 0x1c7   : > { %v523_v24 = vpop.trf.xlu1  ;;  %v491_v25 = vpop.trf.xlu0 }
 0x1c8   : > { %876 = vst.msk [vmem:[%s1377_s24 + $0x4a8] sm:$0xff] %vm726_vm0, %v523_v24  ;;  %860 = vst.msk [vmem:[%s1377_s24 + $0x428] sm:$0xff] %vm726_vm0, %v491_v25 }
 0x1cb   : > { %v524_v26 = vpop.trf.xlu1  ;;  %v492_v27 = vpop.trf.xlu0 }
 0x1cc   : > { %877 = vst.msk [vmem:[%s1377_s24 + $0x4b0] sm:$0xff] %vm726_vm0, %v524_v26  ;;  %861 = vst.msk [vmem:[%s1377_s24 + $0x430] sm:$0xff] %vm726_vm0, %v492_v27 }
 0x1cf   : > { %v525_v28 = vpop.trf.xlu1  ;;  %v493_v29 = vpop.trf.xlu0 }
 0x1d0   : > { %878 = vst.msk [vmem:[%s1377_s24 + $0x4b8] sm:$0xff] %vm726_vm0, %v525_v28  ;;  %862 = vst.msk [vmem:[%s1377_s24 + $0x438] sm:$0xff] %vm726_vm0, %v493_v29 }
 0x1d3   : > { %v526_v30 = vpop.trf.xlu1  ;;  %v494_v31 = vpop.trf.xlu0 }
 0x1d4   : > { %879 = vst.msk [vmem:[%s1377_s24 + $0x4c0] sm:$0xff] %vm726_vm0, %v526_v30  ;;  %863 = vst.msk [vmem:[%s1377_s24 + $0x440] sm:$0xff] %vm726_vm0, %v494_v31 }
 0x1d7   : > { %v527_v32 = vpop.trf.xlu1  ;;  %v495_v33 = vpop.trf.xlu0 }
 0x1d8   : > { %880 = vst.msk [vmem:[%s1377_s24 + $0x4c8] sm:$0xff] %vm726_vm0, %v527_v32  ;;  %864 = vst.msk [vmem:[%s1377_s24 + $0x448] sm:$0xff] %vm726_vm0, %v495_v33 }
 0x1db   : > { %v528_v34 = vpop.trf.xlu1  ;;  %v496_v35 = vpop.trf.xlu0 }
 0x1dc   : > { %881 = vst.msk [vmem:[%s1377_s24 + $0x4d0] sm:$0xff] %vm726_vm0, %v528_v34  ;;  %865 = vst.msk [vmem:[%s1377_s24 + $0x450] sm:$0xff] %vm726_vm0, %v496_v35 }
 0x1df   : > { %v529_v36 = vpop.trf.xlu1  ;;  %v497_v37 = vpop.trf.xlu0 }
 0x1e0   : > { %882 = vst.msk [vmem:[%s1377_s24 + $0x4d8] sm:$0xff] %vm726_vm0, %v529_v36  ;;  %866 = vst.msk [vmem:[%s1377_s24 + $0x458] sm:$0xff] %vm726_vm0, %v497_v37 }
 0x1e3   : > { %v530_v38 = vpop.trf.xlu1  ;;  %v498_v39 = vpop.trf.xlu0 }
 0x1e4   : > { %883 = vst.msk [vmem:[%s1377_s24 + $0x4e0] sm:$0xff] %vm726_vm0, %v530_v38  ;;  %867 = vst.msk [vmem:[%s1377_s24 + $0x460] sm:$0xff] %vm726_vm0, %v498_v39 }
 0x1e7   : > { %v531_v41 = vpop.trf.xlu1  ;;  %v499_v42 = vpop.trf.xlu0 }
 0x1e8   : > { %884 = vst.msk [vmem:[%s1377_s24 + $0x4e8] sm:$0xff] %vm726_vm0, %v531_v41  ;;  %868 = vst.msk [vmem:[%s1377_s24 + $0x468] sm:$0xff] %vm726_vm0, %v499_v42 }
 0x1eb   : > { %v532_v44 = vpop.trf.xlu1  ;;  %v500_v45 = vpop.trf.xlu0  ;;  %694 = vxpose.xlu1.b32.start.end [1/1] (short) %v205_v43, 128  ;;  %662 = vxpose.xlu0.b32.start.end [1/1] (short) %v189_v40, 128 }
 0x1ec   : > { %885 = vst.msk [vmem:[%s1377_s24 + $0x4f0] sm:$0xff] %vm726_vm0, %v532_v44  ;;  %869 = vst.msk [vmem:[%s1377_s24 + $0x470] sm:$0xff] %vm726_vm0, %v500_v45 }
 0x1ef   : > { %v533_v46 = vpop.trf.xlu1  ;;  %v501_v47 = vpop.trf.xlu0 }
 0x1f0   : > { %886 = vst.msk [vmem:[%s1377_s24 + $0x4f8] sm:$0xff] %vm726_vm0, %v533_v46  ;;  %870 = vst.msk [vmem:[%s1377_s24 + $0x478] sm:$0xff] %vm726_vm0, %v501_v47 }
 0x1f3   : > { %v582_v48 = vpop.trf.xlu1  ;;  %v550_v49 = vpop.trf.xlu0 }
 0x1f4   : > { %903 = vst.msk [vmem:[%s1377_s24 + $0x580] sm:$0xff] %vm726_vm0, %v582_v48  ;;  %887 = vst.msk [vmem:[%s1377_s24 + $0x500] sm:$0xff] %vm726_vm0, %v550_v49 }
 0x1f7   : > { %v583_v50 = vpop.trf.xlu1  ;;  %v551_v51 = vpop.trf.xlu0 }
 0x1f8   : > { %904 = vst.msk [vmem:[%s1377_s24 + $0x588] sm:$0xff] %vm726_vm0, %v583_v50  ;;  %888 = vst.msk [vmem:[%s1377_s24 + $0x508] sm:$0xff] %vm726_vm0, %v551_v51 }
 0x1fb   : > { %v584_v52 = vpop.trf.xlu1  ;;  %v552_v53 = vpop.trf.xlu0 }
 0x1fc   : > { %905 = vst.msk [vmem:[%s1377_s24 + $0x590] sm:$0xff] %vm726_vm0, %v584_v52  ;;  %889 = vst.msk [vmem:[%s1377_s24 + $0x510] sm:$0xff] %vm726_vm0, %v552_v53 }
 0x1ff   : > { %v585_v54 = vpop.trf.xlu1  ;;  %v553_v55 = vpop.trf.xlu0 }
 0x200   : > { %906 = vst.msk [vmem:[%s1377_s24 + $0x598] sm:$0xff] %vm726_vm0, %v585_v54  ;;  %890 = vst.msk [vmem:[%s1377_s24 + $0x518] sm:$0xff] %vm726_vm0, %v553_v55 }
 0x203   : > { %v586_v56 = vpop.trf.xlu1  ;;  %v554_v57 = vpop.trf.xlu0 }
 0x204   : > { %907 = vst.msk [vmem:[%s1377_s24 + $0x5a0] sm:$0xff] %vm726_vm0, %v586_v56  ;;  %891 = vst.msk [vmem:[%s1377_s24 + $0x520] sm:$0xff] %vm726_vm0, %v554_v57 }
 0x207   : > { %v587_v58 = vpop.trf.xlu1  ;;  %v555_v59 = vpop.trf.xlu0 }
 0x208   : > { %908 = vst.msk [vmem:[%s1377_s24 + $0x5a8] sm:$0xff] %vm726_vm0, %v587_v58  ;;  %892 = vst.msk [vmem:[%s1377_s24 + $0x528] sm:$0xff] %vm726_vm0, %v555_v59 }
 0x20b   : > { %v588_v60 = vpop.trf.xlu1  ;;  %v556_v61 = vpop.trf.xlu0 }
 0x20c   : > { %909 = vst.msk [vmem:[%s1377_s24 + $0x5b0] sm:$0xff] %vm726_vm0, %v588_v60  ;;  %893 = vst.msk [vmem:[%s1377_s24 + $0x530] sm:$0xff] %vm726_vm0, %v556_v61 }
 0x20f   : > { %v589_v62 = vpop.trf.xlu1  ;;  %v557_v63 = vpop.trf.xlu0 }
 0x210   : > { %910 = vst.msk [vmem:[%s1377_s24 + $0x5b8] sm:$0xff] %vm726_vm0, %v589_v62  ;;  %894 = vst.msk [vmem:[%s1377_s24 + $0x538] sm:$0xff] %vm726_vm0, %v557_v63 }
 0x213   : > { %v590_v0 = vpop.trf.xlu1  ;;  %v558_v1 = vpop.trf.xlu0 }
 0x214   : > { %911 = vst.msk [vmem:[%s1377_s24 + $0x5c0] sm:$0xff] %vm726_vm0, %v590_v0  ;;  %895 = vst.msk [vmem:[%s1377_s24 + $0x540] sm:$0xff] %vm726_vm0, %v558_v1 }
 0x217   : > { %v591_v2 = vpop.trf.xlu1  ;;  %v559_v3 = vpop.trf.xlu0 }
 0x218   : > { %912 = vst.msk [vmem:[%s1377_s24 + $0x5c8] sm:$0xff] %vm726_vm0, %v591_v2  ;;  %896 = vst.msk [vmem:[%s1377_s24 + $0x548] sm:$0xff] %vm726_vm0, %v559_v3 }
 0x21b   : > { %v592_v4 = vpop.trf.xlu1  ;;  %v560_v5 = vpop.trf.xlu0 }
 0x21c   : > { %913 = vst.msk [vmem:[%s1377_s24 + $0x5d0] sm:$0xff] %vm726_vm0, %v592_v4  ;;  %897 = vst.msk [vmem:[%s1377_s24 + $0x550] sm:$0xff] %vm726_vm0, %v560_v5 }
 0x21f   : > { %v593_v6 = vpop.trf.xlu1  ;;  %v561_v7 = vpop.trf.xlu0 }
 0x220   : > { %914 = vst.msk [vmem:[%s1377_s24 + $0x5d8] sm:$0xff] %vm726_vm0, %v593_v6  ;;  %898 = vst.msk [vmem:[%s1377_s24 + $0x558] sm:$0xff] %vm726_vm0, %v561_v7 }
 0x223   : > { %v594_v8 = vpop.trf.xlu1  ;;  %v562_v9 = vpop.trf.xlu0 }
 0x224   : > { %915 = vst.msk [vmem:[%s1377_s24 + $0x5e0] sm:$0xff] %vm726_vm0, %v594_v8  ;;  %899 = vst.msk [vmem:[%s1377_s24 + $0x560] sm:$0xff] %vm726_vm0, %v562_v9 }
 0x227   : > { %v595_v10 = vpop.trf.xlu1  ;;  %v563_v11 = vpop.trf.xlu0 }
 0x228   : > { %916 = vst.msk [vmem:[%s1377_s24 + $0x5e8] sm:$0xff] %vm726_vm0, %v595_v10  ;;  %900 = vst.msk [vmem:[%s1377_s24 + $0x568] sm:$0xff] %vm726_vm0, %v563_v11 }
 0x22b   : > { %v596_v12 = vpop.trf.xlu1  ;;  %v564_v13 = vpop.trf.xlu0 }
 0x22c   : > { %917 = vst.msk [vmem:[%s1377_s24 + $0x5f0] sm:$0xff] %vm726_vm0, %v596_v12  ;;  %901 = vst.msk [vmem:[%s1377_s24 + $0x570] sm:$0xff] %vm726_vm0, %v564_v13 }
 0x22f   : > { %v597_v14 = vpop.trf.xlu1  ;;  %v565_v15 = vpop.trf.xlu0 }
 0x230   : > { %918 = vst.msk [vmem:[%s1377_s24 + $0x5f8] sm:$0xff] %vm726_vm0, %v597_v14  ;;  %902 = vst.msk [vmem:[%s1377_s24 + $0x578] sm:$0xff] %vm726_vm0, %v565_v15 }
 0x233   : > { %v646_v16 = vpop.trf.xlu1  ;;  %v614_v17 = vpop.trf.xlu0 }
 0x234   : > { %935 = vst.msk [vmem:[%s1377_s24 + $0x680] sm:$0xff] %vm726_vm0, %v646_v16  ;;  %919 = vst.msk [vmem:[%s1377_s24 + $0x600] sm:$0xff] %vm726_vm0, %v614_v17 }
 0x237   : > { %v647_v18 = vpop.trf.xlu1  ;;  %v615_v19 = vpop.trf.xlu0 }
 0x238   : > { %936 = vst.msk [vmem:[%s1377_s24 + $0x688] sm:$0xff] %vm726_vm0, %v647_v18  ;;  %920 = vst.msk [vmem:[%s1377_s24 + $0x608] sm:$0xff] %vm726_vm0, %v615_v19 }
 0x23b   : > { %v648_v20 = vpop.trf.xlu1  ;;  %v616_v21 = vpop.trf.xlu0 }
 0x23c   : > { %937 = vst.msk [vmem:[%s1377_s24 + $0x690] sm:$0xff] %vm726_vm0, %v648_v20  ;;  %921 = vst.msk [vmem:[%s1377_s24 + $0x610] sm:$0xff] %vm726_vm0, %v616_v21 }
 0x23f   : > { %v649_v22 = vpop.trf.xlu1  ;;  %v617_v23 = vpop.trf.xlu0 }
 0x240   : > { %938 = vst.msk [vmem:[%s1377_s24 + $0x698] sm:$0xff] %vm726_vm0, %v649_v22  ;;  %922 = vst.msk [vmem:[%s1377_s24 + $0x618] sm:$0xff] %vm726_vm0, %v617_v23 }
 0x243   : > { %v650_v24 = vpop.trf.xlu1  ;;  %v618_v25 = vpop.trf.xlu0 }
 0x244   : > { %939 = vst.msk [vmem:[%s1377_s24 + $0x6a0] sm:$0xff] %vm726_vm0, %v650_v24  ;;  %923 = vst.msk [vmem:[%s1377_s24 + $0x620] sm:$0xff] %vm726_vm0, %v618_v25 }
 0x247   : > { %v651_v26 = vpop.trf.xlu1  ;;  %v619_v27 = vpop.trf.xlu0 }
 0x248   : > { %940 = vst.msk [vmem:[%s1377_s24 + $0x6a8] sm:$0xff] %vm726_vm0, %v651_v26  ;;  %924 = vst.msk [vmem:[%s1377_s24 + $0x628] sm:$0xff] %vm726_vm0, %v619_v27 }
 0x24b   : > { %v652_v28 = vpop.trf.xlu1  ;;  %v620_v29 = vpop.trf.xlu0 }
 0x24c   : > { %941 = vst.msk [vmem:[%s1377_s24 + $0x6b0] sm:$0xff] %vm726_vm0, %v652_v28  ;;  %925 = vst.msk [vmem:[%s1377_s24 + $0x630] sm:$0xff] %vm726_vm0, %v620_v29 }
 0x24f   : > { %v653_v30 = vpop.trf.xlu1  ;;  %v621_v31 = vpop.trf.xlu0 }
 0x250   : > { %942 = vst.msk [vmem:[%s1377_s24 + $0x6b8] sm:$0xff] %vm726_vm0, %v653_v30  ;;  %926 = vst.msk [vmem:[%s1377_s24 + $0x638] sm:$0xff] %vm726_vm0, %v621_v31 }
 0x253   : > { %v654_v32 = vpop.trf.xlu1  ;;  %v622_v33 = vpop.trf.xlu0 }
 0x254   : > { %943 = vst.msk [vmem:[%s1377_s24 + $0x6c0] sm:$0xff] %vm726_vm0, %v654_v32  ;;  %927 = vst.msk [vmem:[%s1377_s24 + $0x640] sm:$0xff] %vm726_vm0, %v622_v33 }
 0x257   : > { %v655_v34 = vpop.trf.xlu1  ;;  %v623_v35 = vpop.trf.xlu0 }
 0x258   : > { %944 = vst.msk [vmem:[%s1377_s24 + $0x6c8] sm:$0xff] %vm726_vm0, %v655_v34  ;;  %928 = vst.msk [vmem:[%s1377_s24 + $0x648] sm:$0xff] %vm726_vm0, %v623_v35 }
 0x25b   : > { %v656_v36 = vpop.trf.xlu1  ;;  %v624_v37 = vpop.trf.xlu0 }
 0x25c   : > { %945 = vst.msk [vmem:[%s1377_s24 + $0x6d0] sm:$0xff] %vm726_vm0, %v656_v36  ;;  %929 = vst.msk [vmem:[%s1377_s24 + $0x650] sm:$0xff] %vm726_vm0, %v624_v37 }
 0x25f   : > { %v657_v38 = vpop.trf.xlu1  ;;  %v625_v39 = vpop.trf.xlu0 }
 0x260   : > { %946 = vst.msk [vmem:[%s1377_s24 + $0x6d8] sm:$0xff] %vm726_vm0, %v657_v38  ;;  %930 = vst.msk [vmem:[%s1377_s24 + $0x658] sm:$0xff] %vm726_vm0, %v625_v39 }
 0x263   : > { %v658_v40 = vpop.trf.xlu1  ;;  %v626_v41 = vpop.trf.xlu0 }
 0x264   : > { %947 = vst.msk [vmem:[%s1377_s24 + $0x6e0] sm:$0xff] %vm726_vm0, %v658_v40  ;;  %931 = vst.msk [vmem:[%s1377_s24 + $0x660] sm:$0xff] %vm726_vm0, %v626_v41 }
 0x267   : > { %v659_v42 = vpop.trf.xlu1  ;;  %v627_v43 = vpop.trf.xlu0 }
 0x268   : > { %948 = vst.msk [vmem:[%s1377_s24 + $0x6e8] sm:$0xff] %vm726_vm0, %v659_v42  ;;  %932 = vst.msk [vmem:[%s1377_s24 + $0x668] sm:$0xff] %vm726_vm0, %v627_v43 }
 0x26b   : > { %v660_v44 = vpop.trf.xlu1  ;;  %v628_v45 = vpop.trf.xlu0 }
 0x26c   : > { %949 = vst.msk [vmem:[%s1377_s24 + $0x6f0] sm:$0xff] %vm726_vm0, %v660_v44  ;;  %933 = vst.msk [vmem:[%s1377_s24 + $0x670] sm:$0xff] %vm726_vm0, %v628_v45 }
 0x26f   : > { %v661_v46 = vpop.trf.xlu1  ;;  %v629_v47 = vpop.trf.xlu0 }
 0x270   : > { %950 = vst.msk [vmem:[%s1377_s24 + $0x6f8] sm:$0xff] %vm726_vm0, %v661_v46  ;;  %934 = vst.msk [vmem:[%s1377_s24 + $0x678] sm:$0xff] %vm726_vm0, %v629_v47 }
 0x273   : > { %v710_v48 = vpop.trf.xlu1  ;;  %v678_v49 = vpop.trf.xlu0 }
 0x274   : > { %967 = vst.msk [vmem:[%s1377_s24 + $0x780] sm:$0xff] %vm726_vm0, %v710_v48  ;;  %951 = vst.msk [vmem:[%s1377_s24 + $0x700] sm:$0xff] %vm726_vm0, %v678_v49 }
 0x277   : > { %v711_v50 = vpop.trf.xlu1  ;;  %v679_v51 = vpop.trf.xlu0 }
 0x278   : > { %968 = vst.msk [vmem:[%s1377_s24 + $0x788] sm:$0xff] %vm726_vm0, %v711_v50  ;;  %952 = vst.msk [vmem:[%s1377_s24 + $0x708] sm:$0xff] %vm726_vm0, %v679_v51 }
 0x27b   : > { %v712_v52 = vpop.trf.xlu1  ;;  %v680_v53 = vpop.trf.xlu0 }
 0x27c   : > { %969 = vst.msk [vmem:[%s1377_s24 + $0x790] sm:$0xff] %vm726_vm0, %v712_v52  ;;  %953 = vst.msk [vmem:[%s1377_s24 + $0x710] sm:$0xff] %vm726_vm0, %v680_v53 }
 0x27f   : > { %v713_v54 = vpop.trf.xlu1  ;;  %v681_v55 = vpop.trf.xlu0 }
 0x280   : > { %970 = vst.msk [vmem:[%s1377_s24 + $0x798] sm:$0xff] %vm726_vm0, %v713_v54  ;;  %954 = vst.msk [vmem:[%s1377_s24 + $0x718] sm:$0xff] %vm726_vm0, %v681_v55 }
 0x283   : > { %v714_v56 = vpop.trf.xlu1  ;;  %v682_v57 = vpop.trf.xlu0 }
 0x284   : > { %971 = vst.msk [vmem:[%s1377_s24 + $0x7a0] sm:$0xff] %vm726_vm0, %v714_v56  ;;  %955 = vst.msk [vmem:[%s1377_s24 + $0x720] sm:$0xff] %vm726_vm0, %v682_v57 }
 0x287   : > { %v715_v58 = vpop.trf.xlu1  ;;  %v683_v59 = vpop.trf.xlu0 }
 0x288   : > { %972 = vst.msk [vmem:[%s1377_s24 + $0x7a8] sm:$0xff] %vm726_vm0, %v715_v58  ;;  %956 = vst.msk [vmem:[%s1377_s24 + $0x728] sm:$0xff] %vm726_vm0, %v683_v59 }
 0x28b   : > { %v716_v60 = vpop.trf.xlu1  ;;  %v684_v61 = vpop.trf.xlu0 }
 0x28c   : > { %973 = vst.msk [vmem:[%s1377_s24 + $0x7b0] sm:$0xff] %vm726_vm0, %v716_v60  ;;  %957 = vst.msk [vmem:[%s1377_s24 + $0x730] sm:$0xff] %vm726_vm0, %v684_v61 }
 0x28f   : > { %v717_v62 = vpop.trf.xlu1  ;;  %v685_v63 = vpop.trf.xlu0 }
 0x290   : > { %974 = vst.msk [vmem:[%s1377_s24 + $0x7b8] sm:$0xff] %vm726_vm0, %v717_v62  ;;  %958 = vst.msk [vmem:[%s1377_s24 + $0x738] sm:$0xff] %vm726_vm0, %v685_v63 }
 0x293   : > { %v718_v0 = vpop.trf.xlu1  ;;  %v686_v1 = vpop.trf.xlu0 }
 0x294   : > { %975 = vst.msk [vmem:[%s1377_s24 + $0x7c0] sm:$0xff] %vm726_vm0, %v718_v0  ;;  %959 = vst.msk [vmem:[%s1377_s24 + $0x740] sm:$0xff] %vm726_vm0, %v686_v1 }
 0x297   : > { %v719_v2 = vpop.trf.xlu1  ;;  %v687_v3 = vpop.trf.xlu0 }
 0x298   : > { %976 = vst.msk [vmem:[%s1377_s24 + $0x7c8] sm:$0xff] %vm726_vm0, %v719_v2  ;;  %960 = vst.msk [vmem:[%s1377_s24 + $0x748] sm:$0xff] %vm726_vm0, %v687_v3 }
 0x29b   : > { %v720_v4 = vpop.trf.xlu1  ;;  %v688_v5 = vpop.trf.xlu0 }
 0x29c   : > { %977 = vst.msk [vmem:[%s1377_s24 + $0x7d0] sm:$0xff] %vm726_vm0, %v720_v4  ;;  %961 = vst.msk [vmem:[%s1377_s24 + $0x750] sm:$0xff] %vm726_vm0, %v688_v5 }
 0x29f   : > { %v721_v6 = vpop.trf.xlu1  ;;  %v689_v7 = vpop.trf.xlu0 }
 0x2a0   : > { %978 = vst.msk [vmem:[%s1377_s24 + $0x7d8] sm:$0xff] %vm726_vm0, %v721_v6  ;;  %962 = vst.msk [vmem:[%s1377_s24 + $0x758] sm:$0xff] %vm726_vm0, %v689_v7 }
 0x2a3   : > { %v722_v8 = vpop.trf.xlu1  ;;  %v690_v9 = vpop.trf.xlu0 }
 0x2a4   : > { %979 = vst.msk [vmem:[%s1377_s24 + $0x7e0] sm:$0xff] %vm726_vm0, %v722_v8  ;;  %963 = vst.msk [vmem:[%s1377_s24 + $0x760] sm:$0xff] %vm726_vm0, %v690_v9 }
 0x2a7   : > { %v723_v10 = vpop.trf.xlu1  ;;  %v691_v11 = vpop.trf.xlu0 }
 0x2a8   : > { %980 = vst.msk [vmem:[%s1377_s24 + $0x7e8] sm:$0xff] %vm726_vm0, %v723_v10  ;;  %964 = vst.msk [vmem:[%s1377_s24 + $0x768] sm:$0xff] %vm726_vm0, %v691_v11 }
 0x2ab   : > { %v724_v12 = vpop.trf.xlu1  ;;  %v692_v13 = vpop.trf.xlu0 }
 0x2ac   : > { %981 = vst.msk [vmem:[%s1377_s24 + $0x7f0] sm:$0xff] %vm726_vm0, %v724_v12  ;;  %965 = vst.msk [vmem:[%s1377_s24 + $0x770] sm:$0xff] %vm726_vm0, %v692_v13 }
 0x2af   : > { %v725_v14 = vpop.trf.xlu1  ;;  %v693_v15 = vpop.trf.xlu0 }
 0x2b0   : > { %982 = vst.msk [vmem:[%s1377_s24 + $0x7f8] sm:$0xff] %vm726_vm0, %v725_v14  ;;  %966 = vst.msk [vmem:[%s1377_s24 + $0x778] sm:$0xff] %vm726_vm0, %v693_v15 }
 0x2b1 PF: > { %s14_s11 = sadd.s32 1, %s1252_s11   ;;  %s1921_s6 = smov %s1236_s7 }
 0x2b2   : > { %p11_p7 = scmp.ge.s32.totalorder %s14_s11, 4   ;;  %s1922_s7 = smov %s1240_s8 }
 0x2b3   : > { %s1923_s8 = smov %s1314_s18  ;;  %s1924_s9 = smov %s1248_s10 }
 0x2b4   : > { %s1925_s10 = smov %s1927_s13  ;;  %13 = sbr.rel (!%p11_p7) target bundleno = 4 (0x4), region = 64 }
 0x2bb   :  { %1019 = vsyncpa [#allocation3], 1 }
 0x2bc   :  { %1021 = vsyncpa [#allocation3 + $0x1], 1 }

</bundles_post_ra>
